<compile_context>
chip_gen: v7x
topology: tpu7x:2x2x1
jax: 0.10.0
libtpu: 0.0.40
codegen_flags: <defaults>
</compile_context>

<pallas_src>
from functools import reduce
from math import pow as _pow

import jax
import jax.numpy as jnp
from jax import lax
from jax.experimental import pallas as pl
from jax.experimental.pallas import tpu as pltpu

LANE = 128
EPS = 1e-5


# ----------------------------- module-shape logic (mirrors PyTorch __init__) -----------------

def get_units(input_shape, num_layers, latent_dim):
    in_units = reduce(lambda a, b: a * b, input_shape)
    shrinkage = int(_pow(in_units // latent_dim, 1.0 / num_layers))
    units = [in_units // shrinkage ** i for i in range(num_layers)]
    return units


# ----------------------------- Pallas kernel -------------------------------------------------

def make_dense_encoder_kernel(n_hidden):
    """Kernel arg order:
       x, (w_i, gamma_i, beta_i) * n_hidden, w_final_pad, b_final_pad, out
    """

    def kernel(*refs):
        x_ref = refs[0]
        out_ref = refs[-1]
        param_refs = refs[1:-1]

        # x tile arrives as f32 (B, in_units); cast to bf16 on the VMEM tile (no wrapper convert)
        h = x_ref[...].astype(jnp.bfloat16)

        # hidden layers: Linear(no bias) -> BatchNorm1d(train mode, fused) -> ReLU
        for i in range(n_hidden):
            w_ref, g_ref, b_ref = param_refs[3 * i: 3 * i + 3]
            # MXU: bf16 x bf16 -> f32 accumulate
            y = jnp.dot(h, w_ref[...], preferred_element_type=jnp.float32)
            # train-mode BN: biased batch variance, eps=1e-5; f32 on the VPU
            mu = jnp.mean(y, axis=0, keepdims=True)            # (1, N)
            d = y - mu                                         # centered, reused below
            var = jnp.mean(d * d, axis=0, keepdims=True)       # biased var, (1, N)
            scale = g_ref[...] * lax.rsqrt(var + EPS)          # (1, N) — EUP rsqrt
            # reuse d: (y-mu)*gamma*rsqrt(var+eps) + beta, one fewer full-width VPU pass
            h = jnp.maximum(d * scale + b_ref[...], 0.0).astype(jnp.bfloat16)

        # final layer: Linear with bias (lane-padded output -> unmasked stores)
        wf_ref, bf_ref = param_refs[3 * n_hidden], param_refs[3 * n_hidden + 1]
        out = jnp.dot(h, wf_ref[...], preferred_element_type=jnp.float32) + bf_ref[...]
        out_ref[...] = out.astype(out_ref.dtype)

    return kernel


def dense_encoder_forward(x, kparams, latent_dim):
    """x: (B, C, H, W)    -> (B, latent_dim)        one DenseEncoder forward (module semantics)
       x: (G, B, C, H, W) -> (G, B, latent_dim)     G independent forwards, one grid axis
       BatchNorm statistics are computed per group of B rows (matches train-mode BN per forward).
    """
    squeeze_group = (x.ndim == 4)
    if squeeze_group:
        x = x[None]
    G, B = x.shape[0], x.shape[1]
    x_flat = x.reshape(G, B, -1)                # torch.flatten(start_dim=1) per group, stays f32
    in_units = x_flat.shape[-1]

    hidden = kparams["hidden"]
    n_hidden = len(hidden)
    wf, bf = kparams["w_final_pad"], kparams["b_final_pad"]
    out_pad_n = wf.shape[1]

    # ---- specs: x/out indexed by g; all parameters VMEM-resident (constant block index) ----
    resident2d = lambda g: (0, 0)
    flat_inputs = [x_flat]
    in_specs = [pl.BlockSpec((None, B, in_units), lambda g: (g, 0, 0))]
    for (w, gm, bt) in hidden:
        flat_inputs += [w, gm, bt]
        in_specs += [pl.BlockSpec(w.shape, resident2d),
                     pl.BlockSpec(gm.shape, resident2d),
                     pl.BlockSpec(bt.shape, resident2d)]
    flat_inputs += [wf, bf]
    in_specs += [pl.BlockSpec(wf.shape, resident2d), pl.BlockSpec(bf.shape, resident2d)]
    out_spec = pl.BlockSpec((None, B, out_pad_n), lambda g: (g, 0, 0))

    # ---- cost estimate (helps XLA position this tiny, latency-bound custom call) ----
    dims = [(w.shape[0], w.shape[1]) for (w, _, _) in hidden] + [wf.shape]
    flops = 2 * G * B * sum(m * n for m, n in dims)
    transc = G * sum(w.shape[1] for (w, _, _) in hidden)   # one rsqrt per BN feature per group
    param_bytes = sum(int(a.size) * a.dtype.itemsize for a in flat_inputs[1:])
    bytes_accessed = int(x_flat.size) * 4 + param_bytes + G * B * out_pad_n * 4
    cost = pl.CostEstimate(flops=int(flops), transcendentals=int(transc),
                           bytes_accessed=int(bytes_accessed))

    # ---- VMEM limit from actual footprint: resident params + double-buffered x/out tiles ----
    # TODO(synk): if layer widths grow far beyond this (~0.4 MiB) size, add a K/out-feature
    #             tiled grid instead of relying on the limit clamp (matters first on v7x 64 MiB).
    max_w = max([w.shape[1] for (w, _, _) in hidden] + [out_pad_n])
    tile_bytes = B * in_units * 4 + B * out_pad_n * 4
    act_bytes = 4 * B * max_w * 4
    vmem_limit = int(min(64 << 20, param_bytes + 2 * tile_bytes + act_bytes + (8 << 20)))

    out_pad = pl.pallas_call(
        make_dense_encoder_kernel(n_hidden),
        grid=(G,),
        out_shape=jax.ShapeDtypeStruct((G, B, out_pad_n), jnp.float32),
        in_specs=in_specs,
        out_specs=out_spec,
        compiler_params=pltpu.CompilerParams(
            dimension_semantics=("parallel",),      # v7x: shard groups across both TCs
            vmem_limit_bytes=vmem_limit),
        cost_estimate=cost,
    )(*flat_inputs)

    out = out_pad[..., :latent_dim]
    return out[0] if squeeze_group else out


# ----------------------------- parameter init + kernel packing -------------------------------

def init_params(key, input_shape, num_layers, latent_dim):
    """Master f32 parameters (used by the pure-JAX reference)."""
    units = get_units(input_shape, num_layers, latent_dim)
    params = {"hidden": []}
    keys = jax.random.split(key, 2 * (len(units) - 1) + 4)
    ki = 0
    for in_u, out_u in zip(units[:-1], units[1:]):
        w = (jax.random.normal(keys[ki], (in_u, out_u), jnp.float32)
             * (1.0 / jnp.sqrt(in_u))); ki += 1
        gamma = 1.0 + 0.1 * jax.random.normal(keys[ki], (1, out_u), jnp.float32); ki += 1
        beta = jnp.zeros((1, out_u), jnp.float32)
        params["hidden"].append((w, gamma, beta))
    in_f = units[-1]
    params["w_final"] = (jax.random.normal(keys[ki], (in_f, latent_dim), jnp.float32)
                         * (1.0 / jnp.sqrt(in_f))); ki += 1
    params["b_final"] = 0.01 * jax.random.normal(keys[ki], (1, latent_dim), jnp.float32)
    return params, units


def pack_params(params, latent_dim):
    """Convert master params to kernel dtypes/layouts:
       - hidden/final weights -> bf16 (MXU operands, half the DMA)
       - gamma/beta stay f32 (BN math stays f32)
       - final weight/bias zero-padded to a lane-dense multiple of 128 columns
    """
    kparams = {"hidden": []}
    for (w, g, b) in params["hidden"]:
        kparams["hidden"].append((w.astype(jnp.bfloat16), g, b))

    in_f, n_out = params["w_final"].shape
    n_pad = ((latent_dim + LANE - 1) // LANE) * LANE
    w_final_pad = jnp.zeros((in_f, n_pad), jnp.bfloat16).at[:, :n_out].set(
        params["w_final"].astype(jnp.bfloat16))
    b_final_pad = jnp.zeros((1, n_pad), jnp.float32).at[:, :n_out].set(params["b_final"])
    kparams["w_final_pad"] = w_final_pad
    kparams["b_final_pad"] = b_final_pad
    return kparams


# ----------------------------- pure-JAX reference (f32, for correctness check) ---------------

def reference_forward(x_nchw, params):
    h = x_nchw.reshape(x_nchw.shape[0], -1)
    for (w, g, b) in params["hidden"]:
        h = h @ w
        mu = jnp.mean(h, axis=0, keepdims=True)
        var = jnp.mean((h - mu) ** 2, axis=0, keepdims=True)
        h = (h - mu) * lax.rsqrt(var + EPS)
        h = jnp.maximum(h * g + b, 0.0)
    return h @ params["w_final"] + params["b_final"]


# ----------------------------- main ----------------------------------------------------------

if __name__ == "__main__":
    # DenseEncoder(input_shape=(2, 16, 16), num_layers=3, latent_dim=32)
    # -> in_units = 512, shrinkage = int(16 ** (1/3)) = 2, units = [512, 256, 128]
    # -> Linear(512,256,no bias)+BN+ReLU, Linear(256,128,no bias)+BN+ReLU, Linear(128,32)+bias
    input_shape = (2, 16, 16)
    num_layers = 3
    latent_dim = 32
    G, B = 4, 16   # 4 independent batch-groups of 16 rows (fills bf16 16-row sublane packing)

    key = jax.random.PRNGKey(0)
    k_x, k_p = jax.random.split(key)
    x_groups = jax.random.normal(k_x, (G, B) + input_shape, jnp.float32)

    params, units = init_params(k_p, input_shape, num_layers, latent_dim)
    kparams = pack_params(params, latent_dim)

    # grouped path: one pallas_call, grid over G, weights stay VMEM-resident across steps
    out_g = jax.block_until_ready(dense_encoder_forward(x_groups, kparams, latent_dim))
    ref_g = jax.vmap(lambda xb: reference_forward(xb, params))(x_groups)
    assert out_g.shape == (G, B, latent_dim), out_g.shape
    err_g = float(jnp.max(jnp.abs(out_g - ref_g)))
    # bf16 matmul operands -> loosened tolerance vs the pure-f32 reference.
    assert jnp.allclose(out_g, ref_g, rtol=5e-2, atol=5e-2), err_g

    # single-batch path: exactly the PyTorch module's forward (one batch, train-mode BN stats)
    out_1 = jax.block_until_ready(dense_encoder_forward(x_groups[0], kparams, latent_dim))
    ref_1 = reference_forward(x_groups[0], params)
    assert out_1.shape == (B, latent_dim), out_1.shape
    err_1 = float(jnp.max(jnp.abs(out_1 - ref_1)))
    assert jnp.allclose(out_1, ref_1, rtol=5e-2, atol=5e-2), err_1

    print("KERNEL_OK")
</pallas_src>

<mosaic_0001>
module attributes {stable_mosaic.version = 11 : i64} {
  func.func @kernel(%arg0: i32, %arg1: memref<1x16x512xf32, #tpu.memory_space<vmem>>, %arg2: memref<512x256xbf16, #tpu.memory_space<vmem>>, %arg3: memref<1x256xf32, #tpu.memory_space<vmem>>, %arg4: memref<1x256xf32, #tpu.memory_space<vmem>>, %arg5: memref<256x128xbf16, #tpu.memory_space<vmem>>, %arg6: memref<1x128xf32, #tpu.memory_space<vmem>>, %arg7: memref<1x128xf32, #tpu.memory_space<vmem>>, %arg8: memref<128x128xbf16, #tpu.memory_space<vmem>>, %arg9: memref<1x128xf32, #tpu.memory_space<vmem>>, %arg10: memref<1x16x128xf32, #tpu.memory_space<vmem>>) attributes {dimension_semantics = [#tpu.dimension_semantics<parallel>], iteration_bounds = array<i64: 4>, scalar_prefetch = 0 : i64, scratch_operands = 0 : i64, tpu.core_type = #tpu.core_type<tc>, window_params = [{transform_indices = @transform_0, window_bounds = array<i64: 1, 16, 512>}, {pipeline_mode = #tpu.pipeline_mode<synchronous>, transform_indices = @transform_1, window_bounds = array<i64: 512, 256>}, {pipeline_mode = #tpu.pipeline_mode<synchronous>, transform_indices = @transform_2, window_bounds = array<i64: 1, 256>}, {pipeline_mode = #tpu.pipeline_mode<synchronous>, transform_indices = @transform_3, window_bounds = array<i64: 1, 256>}, {pipeline_mode = #tpu.pipeline_mode<synchronous>, transform_indices = @transform_4, window_bounds = array<i64: 256, 128>}, {pipeline_mode = #tpu.pipeline_mode<synchronous>, transform_indices = @transform_5, window_bounds = array<i64: 1, 128>}, {pipeline_mode = #tpu.pipeline_mode<synchronous>, transform_indices = @transform_6, window_bounds = array<i64: 1, 128>}, {pipeline_mode = #tpu.pipeline_mode<synchronous>, transform_indices = @transform_7, window_bounds = array<i64: 128, 128>}, {pipeline_mode = #tpu.pipeline_mode<synchronous>, transform_indices = @transform_8, window_bounds = array<i64: 1, 128>}, {transform_indices = @transform_9, window_bounds = array<i64: 1, 16, 128>}]} {
    %c0 = arith.constant 0 : index
    %c0_0 = arith.constant 0 : index
    %c0_1 = arith.constant 0 : index
    %0 = vector.load %arg1[%c0, %c0_0, %c0_1] : memref<1x16x512xf32, #tpu.memory_space<vmem>>, vector<1x16x512xf32>
    %1 = vector.shape_cast %0 : vector<1x16x512xf32> to vector<16x512xf32>
    %2 = arith.truncf %1 : vector<16x512xf32> to vector<16x512xbf16>
    %c0_2 = arith.constant 0 : index
    %c0_3 = arith.constant 0 : index
    %3 = vector.load %arg2[%c0_2, %c0_3] : memref<512x256xbf16, #tpu.memory_space<vmem>>, vector<512x256xbf16>
    %cst = arith.constant dense<0.000000e+00> : vector<16x256xf32>
    %4 = tpu.matmul %2, %3, %cst {dimension_numbers = #tpu.dot_dimension_numbers<[1], [0], [0], [1], [0, 0, 1, 1], [], []>} : vector<16x512xbf16>, vector<512x256xbf16>, vector<16x256xf32> -> vector<16x256xf32>
    %cst_4 = arith.constant dense<0.000000e+00> : vector<256xf32>
    %5 = vector.multi_reduction <add>, %4, %cst_4 [0] : vector<16x256xf32> to vector<256xf32>
    %6 = vector.shape_cast %5 : vector<256xf32> to vector<1x256xf32>
    %cst_5 = arith.constant 1.600000e+01 : f32
    %7 = vector.broadcast %cst_5 : f32 to vector<1x256xf32>
    %8 = arith.divf %6, %7 : vector<1x256xf32>
    %9 = vector.broadcast %8 : vector<1x256xf32> to vector<16x256xf32>
    %10 = arith.subf %4, %9 : vector<16x256xf32>
    %11 = arith.mulf %10, %10 : vector<16x256xf32>
    %cst_6 = arith.constant dense<0.000000e+00> : vector<256xf32>
    %12 = vector.multi_reduction <add>, %11, %cst_6 [0] : vector<16x256xf32> to vector<256xf32>
    %13 = vector.shape_cast %12 : vector<256xf32> to vector<1x256xf32>
    %cst_7 = arith.constant 1.600000e+01 : f32
    %14 = vector.broadcast %cst_7 : f32 to vector<1x256xf32>
    %15 = arith.divf %13, %14 : vector<1x256xf32>
    %c0_8 = arith.constant 0 : index
    %c0_9 = arith.constant 0 : index
    %16 = vector.load %arg3[%c0_8, %c0_9] : memref<1x256xf32, #tpu.memory_space<vmem>>, vector<1x256xf32>
    %cst_10 = arith.constant 9.99999974E-6 : f32
    %17 = vector.broadcast %cst_10 : f32 to vector<1x256xf32>
    %18 = arith.addf %15, %17 : vector<1x256xf32>
    %19 = math.rsqrt %18 : vector<1x256xf32>
    %20 = arith.mulf %16, %19 : vector<1x256xf32>
    %21 = vector.broadcast %20 : vector<1x256xf32> to vector<16x256xf32>
    %22 = arith.mulf %10, %21 : vector<16x256xf32>
    %c0_11 = arith.constant 0 : index
    %c0_12 = arith.constant 0 : index
    %23 = vector.load %arg4[%c0_11, %c0_12] : memref<1x256xf32, #tpu.memory_space<vmem>>, vector<1x256xf32>
    %24 = vector.broadcast %23 : vector<1x256xf32> to vector<16x256xf32>
    %25 = arith.addf %22, %24 : vector<16x256xf32>
    %cst_13 = arith.constant 0.000000e+00 : f32
    %26 = vector.broadcast %cst_13 : f32 to vector<16x256xf32>
    %27 = arith.maximumf %25, %26 : vector<16x256xf32>
    %28 = arith.truncf %27 : vector<16x256xf32> to vector<16x256xbf16>
    %c0_14 = arith.constant 0 : index
    %c0_15 = arith.constant 0 : index
    %29 = vector.load %arg5[%c0_14, %c0_15] : memref<256x128xbf16, #tpu.memory_space<vmem>>, vector<256x128xbf16>
    %cst_16 = arith.constant dense<0.000000e+00> : vector<16x128xf32>
    %30 = tpu.matmul %28, %29, %cst_16 {dimension_numbers = #tpu.dot_dimension_numbers<[1], [0], [0], [1], [0, 0, 1, 1], [], []>} : vector<16x256xbf16>, vector<256x128xbf16>, vector<16x128xf32> -> vector<16x128xf32>
    %cst_17 = arith.constant dense<0.000000e+00> : vector<128xf32>
    %31 = vector.multi_reduction <add>, %30, %cst_17 [0] : vector<16x128xf32> to vector<128xf32>
    %32 = vector.shape_cast %31 : vector<128xf32> to vector<1x128xf32>
    %cst_18 = arith.constant 1.600000e+01 : f32
    %33 = vector.broadcast %cst_18 : f32 to vector<1x128xf32>
    %34 = arith.divf %32, %33 : vector<1x128xf32>
    %35 = vector.broadcast %34 : vector<1x128xf32> to vector<16x128xf32>
    %36 = arith.subf %30, %35 : vector<16x128xf32>
    %37 = arith.mulf %36, %36 : vector<16x128xf32>
    %cst_19 = arith.constant dense<0.000000e+00> : vector<128xf32>
    %38 = vector.multi_reduction <add>, %37, %cst_19 [0] : vector<16x128xf32> to vector<128xf32>
    %39 = vector.shape_cast %38 : vector<128xf32> to vector<1x128xf32>
    %cst_20 = arith.constant 1.600000e+01 : f32
    %40 = vector.broadcast %cst_20 : f32 to vector<1x128xf32>
    %41 = arith.divf %39, %40 : vector<1x128xf32>
    %c0_21 = arith.constant 0 : index
    %c0_22 = arith.constant 0 : index
    %42 = vector.load %arg6[%c0_21, %c0_22] : memref<1x128xf32, #tpu.memory_space<vmem>>, vector<1x128xf32>
    %cst_23 = arith.constant 9.99999974E-6 : f32
    %43 = vector.broadcast %cst_23 : f32 to vector<1x128xf32>
    %44 = arith.addf %41, %43 : vector<1x128xf32>
    %45 = math.rsqrt %44 : vector<1x128xf32>
    %46 = arith.mulf %42, %45 : vector<1x128xf32>
    %47 = vector.broadcast %46 : vector<1x128xf32> to vector<16x128xf32>
    %48 = arith.mulf %36, %47 : vector<16x128xf32>
    %c0_24 = arith.constant 0 : index
    %c0_25 = arith.constant 0 : index
    %49 = vector.load %arg7[%c0_24, %c0_25] : memref<1x128xf32, #tpu.memory_space<vmem>>, vector<1x128xf32>
    %50 = vector.broadcast %49 : vector<1x128xf32> to vector<16x128xf32>
    %51 = arith.addf %48, %50 : vector<16x128xf32>
    %cst_26 = arith.constant 0.000000e+00 : f32
    %52 = vector.broadcast %cst_26 : f32 to vector<16x128xf32>
    %53 = arith.maximumf %51, %52 : vector<16x128xf32>
    %54 = arith.truncf %53 : vector<16x128xf32> to vector<16x128xbf16>
    %c0_27 = arith.constant 0 : index
    %c0_28 = arith.constant 0 : index
    %55 = vector.load %arg8[%c0_27, %c0_28] : memref<128x128xbf16, #tpu.memory_space<vmem>>, vector<128x128xbf16>
    %cst_29 = arith.constant dense<0.000000e+00> : vector<16x128xf32>
    %56 = tpu.matmul %54, %55, %cst_29 {dimension_numbers = #tpu.dot_dimension_numbers<[1], [0], [0], [1], [0, 0, 1, 1], [], []>} : vector<16x128xbf16>, vector<128x128xbf16>, vector<16x128xf32> -> vector<16x128xf32>
    %c0_30 = arith.constant 0 : index
    %c0_31 = arith.constant 0 : index
    %57 = vector.load %arg9[%c0_30, %c0_31] : memref<1x128xf32, #tpu.memory_space<vmem>>, vector<1x128xf32>
    %58 = vector.broadcast %57 : vector<1x128xf32> to vector<16x128xf32>
    %59 = arith.addf %56, %58 : vector<16x128xf32>
    %c0_32 = arith.constant 0 : index
    %c0_33 = arith.constant 0 : index
    %c0_34 = arith.constant 0 : index
    %60 = vector.load %arg10[%c0_32, %c0_33, %c0_34] : memref<1x16x128xf32, #tpu.memory_space<vmem>>, vector<1x16x128xf32>
    %61 = vector.shape_cast %60 : vector<1x16x128xf32> to vector<16x128xf32>
    %62 = vector.shape_cast %59 : vector<16x128xf32> to vector<1x16x128xf32>
    tpu.vector_store %arg10[%c0_32, %c0_33, %c0_34], %62 {strides = array<i32>} : memref<1x16x128xf32, #tpu.memory_space<vmem>>, vector<1x16x128xf32>,
    return
  }
  func.func @transform_0(%arg0: i32) -> (i32, i32, i32) {
    %c0_i32 = arith.constant 0 : i32
    %c0_i32_0 = arith.constant 0 : i32
    %c0_i32_1 = arith.constant 0 : i32
    return %arg0, %c0_i32, %c0_i32_0 : i32, i32, i32
  }
  func.func @transform_1(%arg0: i32) -> (i32, i32) {
    %c0_i32 = arith.constant 0 : i32
    %c0_i32_0 = arith.constant 0 : i32
    %c0_i32_1 = arith.constant 0 : i32
    return %c0_i32, %c0_i32_0 : i32, i32
  }
  func.func @transform_2(%arg0: i32) -> (i32, i32) {
    %c0_i32 = arith.constant 0 : i32
    %c0_i32_0 = arith.constant 0 : i32
    %c0_i32_1 = arith.constant 0 : i32
    return %c0_i32, %c0_i32_0 : i32, i32
  }
  func.func @transform_3(%arg0: i32) -> (i32, i32) {
    %c0_i32 = arith.constant 0 : i32
    %c0_i32_0 = arith.constant 0 : i32
    %c0_i32_1 = arith.constant 0 : i32
    return %c0_i32, %c0_i32_0 : i32, i32
  }
  func.func @transform_4(%arg0: i32) -> (i32, i32) {
    %c0_i32 = arith.constant 0 : i32
    %c0_i32_0 = arith.constant 0 : i32
    %c0_i32_1 = arith.constant 0 : i32
    return %c0_i32, %c0_i32_0 : i32, i32
  }
  func.func @transform_5(%arg0: i32) -> (i32, i32) {
    %c0_i32 = arith.constant 0 : i32
    %c0_i32_0 = arith.constant 0 : i32
    %c0_i32_1 = arith.constant 0 : i32
    return %c0_i32, %c0_i32_0 : i32, i32
  }
  func.func @transform_6(%arg0: i32) -> (i32, i32) {
    %c0_i32 = arith.constant 0 : i32
    %c0_i32_0 = arith.constant 0 : i32
    %c0_i32_1 = arith.constant 0 : i32
    return %c0_i32, %c0_i32_0 : i32, i32
  }
  func.func @transform_7(%arg0: i32) -> (i32, i32) {
    %c0_i32 = arith.constant 0 : i32
    %c0_i32_0 = arith.constant 0 : i32
    %c0_i32_1 = arith.constant 0 : i32
    return %c0_i32, %c0_i32_0 : i32, i32
  }
  func.func @transform_8(%arg0: i32) -> (i32, i32) {
    %c0_i32 = arith.constant 0 : i32
    %c0_i32_0 = arith.constant 0 : i32
    %c0_i32_1 = arith.constant 0 : i32
    return %c0_i32, %c0_i32_0 : i32, i32
  }
  func.func @transform_9(%arg0: i32) -> (i32, i32, i32) {
    %c0_i32 = arith.constant 0 : i32
    %c0_i32_0 = arith.constant 0 : i32
    %c0_i32_1 = arith.constant 0 : i32
    return %arg0, %c0_i32, %c0_i32_0 : i32, i32, i32
  }
}

</mosaic_0001>

<bundles_post_ra>
// kernel: tpu_custom_call.1
= control target key start
LH: loop header
LB: loop body
LE: loop exit
PB: predicated region body
PF: predicated region fallthrough
CT: control target
= control target key end

     0   :  { %s2338_s0 = inlined_call_operand.hbm [shape: f32[4,16,512], index: 0, kind: input, shape index: {}]   ;;  %s2339_s1 = inlined_call_operand.hbm [shape: bf16[512,256], index: 1, kind: input, shape index: {}]   ;;  %s2340_s2 = inlined_call_operand.vmem [shape: f32[1,256], index: 2, kind: input, shape index: {}]   ;;  %s2341_s3 = inlined_call_operand.vmem [shape: f32[1,256], index: 3, kind: input, shape index: {}]   ;;  %s2342_s4 = inlined_call_operand.hbm [shape: bf16[256,128], index: 4, kind: input, shape index: {}]   ;;  %s2343_s5 = inlined_call_operand.vmem [shape: f32[1,128], index: 5, kind: input, shape index: {}]   ;;  %s2344_s6 = inlined_call_operand.vmem [shape: f32[1,128], index: 6, kind: input, shape index: {}]   ;;  %s2345_s7 = inlined_call_operand.hbm [shape: bf16[128,128], index: 7, kind: input, shape index: {}]   ;;  %s2346_s8 = inlined_call_operand.vmem [shape: f32[1,128], index: 8, kind: input, shape index: {}]   ;;  %s2347_s9 = inlined_call_operand.hbm [shape: f32[4,16,128], index: 9, kind: output, shape index: {}]  }
   0x1   :  { %2354 = sst [smem:[#allocation17_spill]] %s2339_s1 }
   0x2   :  { %2355 = sst [smem:[#allocation18_spill]] %s2347_s9 }
   0x3   :  { %14 = vsyncpa [#allocation3], 0 }
   0x4   :  { %16 = vsyncpa [#allocation3 + $0x1], 0 }
   0x5   :  { %17 = vsyncpa [#allocation6], 0 }
   0x6   :  { %18 = vsyncpa [#allocation9], 0 }
   0x7   :  { %19 = vsyncpa [#allocation4], 0 }
   0x8   :  { %21 = vsyncpa [#allocation4 + $0x1], 0  ;;  %s2060_s30 = smov 0   ;;  %s2062_s10 = smov 0  }
   0x9   :  { %s2064_s11 = smov 0   ;;  %s2066_s12 = smov 0  }
   0xa LB: > { %2356 = sst [smem:[#allocation15_spill]] %s1980_s30  ;;  %s2081_s13 = sadd.s32 4294967295, %s1992_s12   ;;  %s1992_s12 = sphi %s2066_s12, %s2380_s12   ;;  %s1988_s11 = sphi %s2064_s11, %s2379_s11   ;;  %s1984_s10 = sphi %s2062_s10, %s2378_s10   ;;  %s1980_s30 = sphi %s2060_s30, %s2377_s30  }
   0xb   : > { %s1423_s14 = sadd.s32 4294967294, %s1992_s12   ;;  %p47_p0 = scmp.ne.s32.totalorder %s1984_s10, %s1980_s30 }
   0xc   : > { %p2348_p1 = scmp.eq.s32.totalorder %s2081_s13, 0  ;;  %p245_p3 = scmp.eq.s32.totalorder %s1423_s14, 3 }
   0xd   : > { %p1424_p5 = scmp.ge.s32.totalorder %s1992_s12, 1  ;;  %p252_p7 = scmp.lt.s32.totalorder %s1992_s12, 5 }
   0xe   : > { %p2090_p4 = por %p2348_p1, %p47_p0  ;;  %p2095_p6 = por %p245_p3, %p47_p0 }
   0xf   : > { %p2100_p8 = pnand %p1424_p5, %p252_p7  ;;  %s1994_s18 = smov [#allocation5]  }
  0x10   : > { %s2357_s15 = scalar_select %p2090_p4, 1, 0 }
  0x11   : > { %s2358_s16 = scalar_select %p2095_p6, 1, 0 }
  0x12   : > { %s2360_s17 = scalar_select %p2100_p8, 1, 0 }
  0x13   : > { %2359 = sst [smem:[#allocation16_spill]] %s2358_s16  ;;  %s264_s19 = sshll.u32 %s1994_s18, 4  ;;  %s265_s19 = int_to_ptr.vmem [resolvable:$true] %s264_s19 }
  0x14   : > { %p1606_p9 = pneg %p2100_p8  ;;  %s1995_s21 = smov [#allocation7]  }
  0x15   : > { %s283_s22 = sshll.u32 %s1995_s21, 4  ;;  %s2362_s1 = sld [smem:[#allocation17_spill]]  ;;  %s2112_s22 = int_to_ptr.vmem [resolvable:$true] %s283_s22 }
  0x16   : > { %p2108_p10 = pnand %p1606_p9, %p2348_p1 }
  0x18   : > { %p2122_p12 = pneg %p2108_p10 }
  0x1b   : > { %s1804_s25 = scalar_lea.hbm %s2362_s1, 8192 }
  0x1c   : > { %p1805_p11 = scmp.ne.s32.totalorder %s2362_s1, %s1804_s25  ;;  %p1811_p3 = scmp.lt.u32.totalorder %s1804_s25, %s2362_s1 }
  0x1e   : > { %p1807_p13 = pnand %p2122_p12, %p1805_p11 }
  0x20   : > { %p1808_p0 = pneg %p1807_p13 }
  0x22   : > { %p1813_p5 = pnand %p1811_p3, %p1808_p0 }
  0x24   : > { %1816 = shalt.err (!%p1813_p5)
}
  0x25   : > { %s1817_s18 = scalar_lea.vmem %s265_s19, 8192  ;;  %p1825_p2 = scmp.lt.s32.totalorder %s265_s19, %s265_s19 }
  0x26   : > { %p1818_p7 = scmp.ne.s32.totalorder %s265_s19, %s1817_s18  ;;  %p1826_p6 = scmp.lt.s32.totalorder %s1817_s18, %s1817_s18 }
  0x28   : > { %p1820_p9 = pnand %p1818_p7, %p2122_p12  ;;  %p1827_p4 = por %p1826_p6, %p1825_p2 }
  0x2a   : > { %p1821_p1 = pneg %p1820_p9 }
  0x2c   : > { %p1828_p8 = pnand %p1827_p4, %p1821_p1 }
  0x2e   : > { %1831 = shalt.err (!%p1828_p8)
}
  0x2f   : > { %s1996_s21 = smov 128   ;;  %s1997_s23 = smov 8  }
  0x30   : > { %1609 = dma.hbm_to_vmem [thread:$0]  (!%p2108_p10), %s2362_s1, 8192, %s265_s19, [#allocation6], %s1996_s21, %s1996_s21, %s1997_s23  }
  0x31   : > { %s1832_s29 = scalar_lea.hbm %s2342_s4, 2048 }
  0x32   : > { %p1833_p11 = scmp.ne.s32.totalorder %s2342_s4, %s1832_s29  ;;  %p1839_p4 = scmp.lt.u32.totalorder %s1832_s29, %s2342_s4 }
  0x34   : > { %p1835_p1 = pnand %p1833_p11, %p2122_p12 }
  0x36   : > { %p1836_p2 = pneg %p1835_p1 }
  0x38   : > { %p1841_p6 = pnand %p1839_p4, %p1836_p2 }
  0x3a   : > { %1844 = shalt.err (!%p1841_p6)
}
  0x3b   : > { %s1845_s19 = scalar_lea.vmem %s2112_s22, 2048  ;;  %p1853_p3 = scmp.lt.s32.totalorder %s2112_s22, %s2112_s22 }
  0x3c   : > { %p1846_p8 = scmp.ne.s32.totalorder %s2112_s22, %s1845_s19  ;;  %p1854_p5 = scmp.lt.s32.totalorder %s1845_s19, %s1845_s19 }
  0x3e   : > { %p1848_p13 = pnand %p1846_p8, %p2122_p12  ;;  %p1855_p7 = por %p1854_p5, %p1853_p3 }
  0x40   : > { %p1849_p0 = pneg %p1848_p13 }
  0x42   : > { %p1856_p9 = pnand %p1855_p7, %p1849_p0 }
  0x44   : > { %1859 = shalt.err (!%p1856_p9)
}
  0x45   : > { %s1998_s16 = smov 64   ;;  %s1999_s30 = smov 4  }
  0x46   : > { %1612 = dma.hbm_to_vmem [thread:$0]  (!%p2108_p10), %s2342_s4, 2048, %s2112_s22, [#allocation6], %s1998_s16, %s1998_s16, %s1999_s30  }
  0x47   : > { %s2000_s24 = smov [#allocation8]   ;;  %s2162_s26 = sadd.s32 1, %s1992_s12  }
  0x48   : > { %s302_s25 = sshll.u32 %s2000_s24, 4  ;;  %s1860_s14 = scalar_lea.hbm %s2345_s7, 1024  ;;  %s303_s25 = int_to_ptr.vmem [resolvable:$true] %s302_s25 }
  0x49   : > { %p1861_p11 = scmp.ne.s32.totalorder %s2345_s7, %s1860_s14  ;;  %p1867_p4 = scmp.lt.u32.totalorder %s1860_s14, %s2345_s7 }
  0x4b   : > { %p1863_p1 = pnand %p1861_p11, %p2122_p12 }
  0x4d   : > { %p1864_p2 = pneg %p1863_p1 }
  0x4f   : > { %p1869_p6 = pnand %p1867_p4, %p1864_p2 }
  0x51   : > { %1872 = shalt.err (!%p1869_p6)
}
  0x52   : > { %s1873_s22 = scalar_lea.vmem %s303_s25, 1024  ;;  %p1881_p3 = scmp.lt.s32.totalorder %s303_s25, %s303_s25 }
  0x53   : > { %p1874_p8 = scmp.ne.s32.totalorder %s303_s25, %s1873_s22  ;;  %p1882_p5 = scmp.lt.s32.totalorder %s1873_s22, %s1873_s22 }
  0x55   : > { %p1876_p13 = pnand %p1874_p8, %p2122_p12  ;;  %p1883_p7 = por %p1882_p5, %p1881_p3 }
  0x57   : > { %p1877_p0 = pneg %p1876_p13 }
  0x59   : > { %p1884_p9 = pnand %p1883_p7, %p1877_p0 }
  0x5b   : > { %1887 = shalt.err (!%p1884_p9)
}
  0x5c   : > { %1615 = dma.hbm_to_vmem [thread:$0]  (!%p2108_p10), %s2345_s7, 1024, %s303_s25, [#allocation9], %s1998_s16, %s1998_s16, %s1999_s30  }
  0x5d   : > { %s31_s1 = ssub.s32 %s1992_s12, %s2162_s26  ;;  %s34_s9 = sadd.s32 1, %s1988_s11 }
  0x5e   : > { %p32_p12 = scmp.eq.s32.totalorder %s31_s1, 0  ;;  %p41_p11 = scmp.ne.s32.totalorder %s1988_s11, %s1984_s10 }
  0x5f   : > { %p42_p1 = scmp.eq.s32.totalorder %s1992_s12, 0  ;;  %p1627_p2 = scmp.lt.s32.totalorder %s1992_s12, 4 }
  0x60   : > { %s2190_s20 = scalar_select %p32_p12, %s1988_s11, %s34_s9  }
  0x61   : > { %p43_p4 = por %p42_p1, %p41_p11  ;;  %p2364_p6 = scmp.eq.s32.totalorder %s2081_s13, 3 }
  0x62   : > { %s319_s24 = sand.u32 1, %s1988_s11   ;;  %s1533_s27 = sshll.u32 %s1992_s12, 10 }
  0x63   : > { %p2194_p8 = por %p2364_p6, %p41_p11  ;;  %s1429_s29 = sshll.u32 %s319_s24, 6 }
  0x64   : > { %s2203_s16 = scalar_lea.hbm %s2338_s0, %s1533_s27  ;;  %s323_s30 = scalar_lea.vmem [#allocation2], %s1429_s29 }
  0x65   : > { %s330_s25 = sshll.u32 %s323_s30, 4  ;;  %p2205_p10 = pnand %p1627_p2, %p43_p4  ;;  %s2209_s25 = int_to_ptr.vmem [resolvable:$true] %s330_s25 }
  0x66   : > { %s2211_s22 = scalar_lea.sflag [#allocation3], %s319_s24  ;;  %s1888_s21 = scalar_lea.hbm %s2203_s16, 1024 }
  0x67   : > { %p1889_p13 = scmp.ne.s32.totalorder %s2203_s16, %s1888_s21  ;;  %p1890_p0 = pneg %p2205_p10 }
  0x68   : > { %s1893_s9 = scalar_lea.hbm %s2338_s0, 4096  ;;  %p1894_p7 = scmp.lt.u32.totalorder %s2203_s16, %s2338_s0 }
  0x69   : > { %p1891_p3 = pnand %p1890_p0, %p1889_p13  ;;  %p1895_p9 = scmp.lt.u32.totalorder %s1893_s9, %s1888_s21 }
  0x6a   : > { %p1897_p11 = scmp.lt.u32.totalorder %s1888_s21, %s2203_s16 }
  0x6b   : > { %p1892_p5 = pneg %p1891_p3  ;;  %p1896_p12 = por %p1895_p9, %p1894_p7 }
  0x6d   : > { %p1898_p1 = por %p1897_p11, %p1896_p12 }
  0x6f   : > { %p1899_p2 = pnand %p1898_p1, %p1892_p5 }
  0x71   : > { %1902 = shalt.err (!%p1899_p2)
}
  0x72   : > { %s1903_s24 = scalar_lea.vmem %s2209_s25, 1024  ;;  %s2001_s14 = smov [#allocation2]  }
  0x73   : > { %p1904_p4 = scmp.ne.s32.totalorder %s2209_s25, %s1903_s24  ;;  %s1908_s18 = sshll.u32 %s2001_s14, 4  ;;  %s1909_s18 = int_to_ptr.vmem [resolvable:$false] %s1908_s18 }
  0x74   : > { %s1910_s30 = scalar_lea.vmem %s1909_s18, 2048  ;;  %p1911_p3 = scmp.lt.s32.totalorder %s2209_s25, %s1909_s18 }
  0x75   : > { %p1906_p6 = pnand %p1904_p4, %p1890_p0  ;;  %p1912_p7 = scmp.lt.s32.totalorder %s1910_s30, %s1903_s24 }
  0x77   : > { %p1907_p13 = pneg %p1906_p6  ;;  %p1913_p9 = por %p1912_p7, %p1911_p3 }
  0x79   : > { %p1914_p12 = pnand %p1913_p9, %p1907_p13 }
  0x7b   : > { %1917 = shalt.err (!%p1914_p12)
}
  0x7c   : > { %s2002_s21 = smov 512   ;;  %s2003_s23 = smov 32  }
  0x7d   : > { %1619 = dma.hbm_to_vmem [thread:$0]  (!%p2205_p10), %s2203_s16, 1024, %s2209_s25, %s2211_s22, %s2002_s21, %s2002_s21, %s2003_s23  }
  0x7e   : > { %p2367_p0 = scmp.ne.s32.totalorder %s2360_s17, 0 }
  0x7f   : > { %s2242_s1 = sand.u32 (!%p2367_p0), 1, %s1984_s10   ;;  %p2368_p5 = scmp.ne.s32.totalorder (!%p2367_p0), %s2357_s15, 0 }
  0x80   : > { %342 = sbr.rel (%p2367_p0) target bundleno = 1063 (0x427), region = 56  ;;  %s1433_s9 = sshll.u32 (!%p2367_p0), %s2242_s1, 6 }
  0x81   : > { %s345_s27 = scalar_lea.sflag (!%p2367_p0), [#allocation3], %s2242_s1  ;;  %s2246_s29 = scalar_lea.vmem (!%p2367_p0), [#allocation2], %s1433_s9 }
  0x87   : > { %1963 = dma.done.wait (%p2368_p5), %s345_s27, 1024  }
  0x88   : > { %1965 = vsyncadd (%p2368_p5), %s345_s27, 4294966272  ;;  %p2369_p10 = scmp.eq.s32.totalorder %s2081_s13, 0 }
  0x8a   : > { %1967 = dma.done.wait (%p2369_p10), [#allocation6], 10240   ;;  %p2370_p11 = pmov %p2369_p10 }
  0x8b   : > { %p2371_p1 = pmov %p2369_p10 }
  0x8c   : > { %1969 = vsyncadd (%p2370_p11), [#allocation6], 4294957056 }
  0x8d   : > { %1971 = dma.done.wait (%p2371_p1), [#allocation9], 1024   ;;  %p2372_p2 = pmov %p2371_p1 }
  0x8e   : > { %v1678_v0 = vld [vmem:[#allocation5 + $0x4] ss:$8 sps:$4 sm:$0xff]   ;;  %v1680_v1 = vld [vmem:[#allocation5] ss:$8 sps:$4 sm:$0xff]   ;;  %v1681_v2 = vld [vmem:[#allocation5 + $0x14] ss:$8 sps:$4 sm:$0xff]  }
  0x8f   : > { %1973 = vsyncadd (%p2372_p2), [#allocation9], 4294966272  ;;  %792 = vmatprep.subr.bf16.mxu0 %v1678_v0  ;;  %v1683_v3 = vld [vmem:[#allocation5 + $0x10] ss:$8 sps:$4 sm:$0xff]   ;;  %v1684_v4 = vld [vmem:[#allocation5 + $0x24] ss:$8 sps:$4 sm:$0xff]  }
  0x90   : > { %793 = vmatpush1.bf16.msra.mxu0 %v1680_v1  ;;  %v1686_v5 = vld [vmem:[#allocation5 + $0x20] ss:$8 sps:$4 sm:$0xff]   ;;  %v1687_v6 = vld [vmem:[#allocation5 + $0x34] ss:$8 sps:$4 sm:$0xff]   ;;  %v1689_v7 = vld [vmem:[#allocation5 + $0x30] ss:$8 sps:$4 sm:$0xff]  }
  0x91   : > { %794 = vmatprep.subr.bf16.mxu0 %v1681_v2  ;;  %v1690_v8 = vld [vmem:[#allocation5 + $0x44] ss:$8 sps:$4 sm:$0xff]   ;;  %v1692_v9 = vld [vmem:[#allocation5 + $0x40] ss:$8 sps:$4 sm:$0xff]   ;;  %v1693_v10 = vld [vmem:[#allocation5 + $0x54] ss:$8 sps:$4 sm:$0xff]  }
  0x92   : > { %v1695_v11 = vld [vmem:[#allocation5 + $0x50] ss:$8 sps:$4 sm:$0xff]   ;;  %v1696_v12 = vld [vmem:[#allocation5 + $0x64] ss:$8 sps:$4 sm:$0xff]   ;;  %v1698_v16 = vld [vmem:[#allocation5 + $0x60] ss:$8 sps:$4 sm:$0xff]  }
  0x93   : > { %v397_v13 = vld [vmem:[%s2246_s29 + $0x8] sm:$0xff]  ;;  %v1699_v17 = vld [vmem:[#allocation5 + $0x74] ss:$8 sps:$4 sm:$0xff]   ;;  %v1701_v18 = vld [vmem:[#allocation5 + $0x70] ss:$8 sps:$4 sm:$0xff]   ;;  %vm2006_vm0 = vmmov 0  }
  0x94   : > { %795 = vmatpush1.bf16.msra.mxu0 %v1683_v3  ;;  %v401_v14 = vld [vmem:[%s2246_s29 + $0x28] sm:$0xff]  ;;  %v1705_v21 = vld [vmem:[#allocation5 + $0x94] ss:$8 sps:$4 sm:$0xff]   ;;  %v1707_v22 = vld [vmem:[#allocation5 + $0x90] ss:$8 sps:$4 sm:$0xff]   ;;  %s1437_s18 = sshll.u32 %s2242_s1, 4 }
  0x95   : > { %796 = vmatprep.subr.bf16.mxu0 %v1684_v4  ;;  %v405_v15 = vpack.c.bf16 %v401_v14, %v397_v13  ;;  %v1702_v19 = vld [vmem:[#allocation5 + $0x84] ss:$8 sps:$4 sm:$0xff]   ;;  %v1704_v20 = vld [vmem:[#allocation5 + $0x80] ss:$8 sps:$4 sm:$0xff]   ;;  %v1711_v25 = vld [vmem:[#allocation5 + $0xb4] ss:$8 sps:$4 sm:$0xff]  }
  0x96   : > { %v1708_v23 = vld [vmem:[#allocation5 + $0xa4] ss:$8 sps:$4 sm:$0xff]   ;;  %v1710_v24 = vld [vmem:[#allocation5 + $0xa0] ss:$8 sps:$4 sm:$0xff]   ;;  %v1713_v26 = vld [vmem:[#allocation5 + $0xb0] ss:$8 sps:$4 sm:$0xff]  }
  0x97   : > { %824 = vmatprep.mubr.bf16.mxu0 %v405_v15  ;;  %v1714_v27 = vld [vmem:[#allocation5 + $0xc4] ss:$8 sps:$4 sm:$0xff]   ;;  %v1716_v28 = vld [vmem:[#allocation5 + $0xc0] ss:$8 sps:$4 sm:$0xff]   ;;  %v1717_v29 = vld [vmem:[#allocation5 + $0xd4] ss:$8 sps:$4 sm:$0xff]  }
  0x98   : > { %797 = vmatpush1.bf16.msra.mxu0 %v1686_v5  ;;  %v1719_v30 = vld [vmem:[#allocation5 + $0xd0] ss:$8 sps:$4 sm:$0xff]   ;;  %v1720_v31 = vld [vmem:[#allocation5 + $0xe4] ss:$8 sps:$4 sm:$0xff]   ;;  %v1722_v32 = vld [vmem:[#allocation5 + $0xe0] ss:$8 sps:$4 sm:$0xff]  }
  0x99   : > { %798 = vmatprep.subr.bf16.mxu0 %v1687_v6  ;;  %v1723_v33 = vld [vmem:[#allocation5 + $0xf4] ss:$8 sps:$4 sm:$0xff]   ;;  %v1725_v34 = vld [vmem:[#allocation5 + $0xf0] ss:$8 sps:$4 sm:$0xff]   ;;  %v396_v35 = vld [vmem:[%s2246_s29] sm:$0xff]  ;;  %s394_s23 = scalar_lea.vmem [#allocation10], %s1437_s18 }
  0x9a   : > { %v400_v36 = vld [vmem:[%s2246_s29 + $0x20] sm:$0xff]  ;;  %v399_v38 = vld [vmem:[%s2246_s29 + $0x18] sm:$0xff]  ;;  %v1776_v14 = vld [vmem:[#allocation7 + $0x48] sm:$0xff]   ;;  %s1321_s9 = sshll.u32 %s394_s23, 4  ;;  %s1534_s27 = sshll.u32 %s2081_s13, 8  ;;  %s2290_s9 = int_to_ptr.vmem [resolvable:$true] %s1321_s9 }
  0x9b   : > { %v1728_v37 = vld [vmem:[#allocation5 + $0x104] ss:$8 sps:$4 sm:$0xff]   ;;  %v403_v39 = vld [vmem:[%s2246_s29 + $0x38] sm:$0xff]  ;;  %v404_v40 = vpack.c.bf16 %v400_v36, %v396_v35  ;;  %v1726_v41 = vld [vmem:[#allocation5 + $0x100] ss:$8 sps:$4 sm:$0xff]   ;;  %s2373_s17 = sld [smem:[#allocation18_spill]] }
  0x9c   : > { %799 = vmatpush1.bf16.msra.mxu0 %v1689_v7  ;;  %v407_v42 = vpack.c.bf16 %v403_v39, %v399_v38  ;;  %v1731_v43 = vld [vmem:[#allocation5 + $0x114] ss:$8 sps:$4 sm:$0xff]   ;;  %v1729_v44 = vld [vmem:[#allocation5 + $0x110] ss:$8 sps:$4 sm:$0xff]   ;;  %v1734_v45 = vld [vmem:[#allocation5 + $0x124] ss:$8 sps:$4 sm:$0xff]  }
  0x9d   : > { %800 = vmatprep.subr.bf16.mxu0 %v1690_v8  ;;  %v1732_v46 = vld [vmem:[#allocation5 + $0x120] ss:$8 sps:$4 sm:$0xff]   ;;  %v1737_v47 = vld [vmem:[#allocation5 + $0x134] ss:$8 sps:$4 sm:$0xff]   ;;  %v1735_v48 = vld [vmem:[#allocation5 + $0x130] ss:$8 sps:$4 sm:$0xff]  }
  0x9e   : > { %v1740_v49 = vld [vmem:[#allocation5 + $0x144] ss:$8 sps:$4 sm:$0xff]   ;;  %v1738_v50 = vld [vmem:[#allocation5 + $0x140] ss:$8 sps:$4 sm:$0xff]   ;;  %v1743_v51 = vld [vmem:[#allocation5 + $0x154] ss:$8 sps:$4 sm:$0xff]  }
  0x9f   : > { %v1741_v52 = vld [vmem:[#allocation5 + $0x150] ss:$8 sps:$4 sm:$0xff]   ;;  %v1746_v53 = vld [vmem:[#allocation5 + $0x164] ss:$8 sps:$4 sm:$0xff]   ;;  %v1744_v54 = vld [vmem:[#allocation5 + $0x160] ss:$8 sps:$4 sm:$0xff]  }
  0xa0   : > { %801 = vmatpush1.bf16.msra.mxu0 %v1692_v9  ;;  %v1749_v55 = vld [vmem:[#allocation5 + $0x174] ss:$8 sps:$4 sm:$0xff]   ;;  %v1747_v56 = vld [vmem:[#allocation5 + $0x170] ss:$8 sps:$4 sm:$0xff]   ;;  %v1752_v57 = vld [vmem:[#allocation5 + $0x184] ss:$8 sps:$4 sm:$0xff]  }
  0xa1   : > { %802 = vmatprep.subr.bf16.mxu0 %v1693_v10  ;;  %v1750_v58 = vld [vmem:[#allocation5 + $0x180] ss:$8 sps:$4 sm:$0xff]   ;;  %v1755_v59 = vld [vmem:[#allocation5 + $0x194] ss:$8 sps:$4 sm:$0xff]   ;;  %v1753_v60 = vld [vmem:[#allocation5 + $0x190] ss:$8 sps:$4 sm:$0xff]   ;;  %s2295_s16 = scalar_lea.hbm %s2373_s17, %s1534_s27 }
  0xa2   : > { %v1758_v61 = vld [vmem:[#allocation5 + $0x1a4] ss:$8 sps:$4 sm:$0xff]   ;;  %v1756_v62 = vld [vmem:[#allocation5 + $0x1a0] ss:$8 sps:$4 sm:$0xff]   ;;  %v1761_v63 = vld [vmem:[#allocation5 + $0x1b4] ss:$8 sps:$4 sm:$0xff]  }
  0xa3   : > { %v1759_v0 = vld [vmem:[#allocation5 + $0x1b0] ss:$8 sps:$4 sm:$0xff]   ;;  %v1764_v1 = vld [vmem:[#allocation5 + $0x1c4] ss:$8 sps:$4 sm:$0xff]   ;;  %v1762_v2 = vld [vmem:[#allocation5 + $0x1c0] ss:$8 sps:$4 sm:$0xff]  }
  0xa4   : > { %803 = vmatpush1.bf16.msra.mxu0 %v1695_v11  ;;  %v1767_v3 = vld [vmem:[#allocation5 + $0x1d4] ss:$8 sps:$4 sm:$0xff]   ;;  %v1765_v4 = vld [vmem:[#allocation5 + $0x1d0] ss:$8 sps:$4 sm:$0xff]   ;;  %v1770_v5 = vld [vmem:[#allocation5 + $0x1e4] ss:$8 sps:$4 sm:$0xff]  }
  0xa5   : > { %804 = vmatprep.subr.bf16.mxu0 %v1696_v12  ;;  %v1768_v6 = vld [vmem:[#allocation5 + $0x1e0] ss:$8 sps:$4 sm:$0xff]   ;;  %v1773_v7 = vld [vmem:[#allocation5 + $0x1f4] ss:$8 sps:$4 sm:$0xff]   ;;  %v1771_v8 = vld [vmem:[#allocation5 + $0x1f0] ss:$8 sps:$4 sm:$0xff]  }
  0xa6   : > { %v398_v9 = vld [vmem:[%s2246_s29 + $0x10] sm:$0xff]  ;;  %v1774_v12 = vld [vmem:[#allocation7 + $0x40] sm:$0xff]   ;;  %v1777_v15 = vld [vmem:[#allocation7 + $0x8] sm:$0xff]   ;;  %s1308_s25 = scalar_lea.sflag [#allocation4], %s2242_s1  ;;  %s1918_s13 = scalar_lea.vmem %s2290_s9, 256 }
  0xa7   : > { %v402_v10 = vld [vmem:[%s2246_s29 + $0x30] sm:$0xff]  ;;  %v1775_v13 = vld [vmem:[#allocation7] sm:$0xff]   ;;  %1535 = vmatprep.subr.bf16.mxu1 %v1774_v12  ;;  %v930_v12 = vlaneseq  ;;  %p1919_p4 = scmp.ne.s32.totalorder %s2290_s9, %s1918_s13  ;;  %s2007_s19 = smov [#allocation10]  }
  0xa8   : > { %805 = vmatpush1.bf16.msra.mxu0 %v1698_v16  ;;  %v406_v11 = vpack.c.bf16 %v402_v10, %v398_v9  ;;  %1536 = vmatpush3.bf16.msra.mxu1 %v1775_v13  ;;  %v1778_v16 = vld [vmem:[#allocation7 + $0x50] sm:$0xff]   ;;  %v2004_v10 = vmov 1966171168   ;;  %s1922_s22 = sshll.u32 %s2007_s19, 4  ;;  %s1923_s22 = int_to_ptr.vmem [resolvable:$false] %s1922_s22 }
  0xa9   : > { %806 = vmatprep.subr.bf16.mxu0 %v1699_v17  ;;  %1537 = vmatprep.subr.bf16.mxu1 %v1776_v14  ;;  %v1779_v17 = vld [vmem:[#allocation7 + $0x10] sm:$0xff]   ;;  %v931_v14 = vshrl.u32 %v930_v12, 7  ;;  %p1920_p6 = pnand %p1919_p4, %p2194_p8  ;;  %s1924_s24 = scalar_lea.vmem %s1923_s22, 512 }
  0xaa   : > { %p1925_p3 = scmp.lt.s32.totalorder %s2290_s9, %s1923_s22  ;;  %p1926_p7 = scmp.lt.s32.totalorder %s1924_s24, %s1918_s13 }
  0xab   : > { %p1921_p13 = pneg %p1920_p6 }
  0xac   : > { %807 = vmatpush1.bf16.msra.mxu0 %v1701_v18  ;;  %1538 = vmatpush3.bf16.msra.mxu1 %v1777_v15  ;;  %v1780_v18 = vld [vmem:[#allocation7 + $0x58] sm:$0xff]   ;;  %p1927_p9 = por %p1926_p7, %p1925_p3 }
  0xad   : > { %808 = vmatprep.subr.bf16.mxu0 %v1702_v19  ;;  %1539 = vmatprep.subr.bf16.mxu1 %v1778_v16  ;;  %v1781_v19 = vld [vmem:[#allocation7 + $0x18] sm:$0xff]  }
  0xae   : > { %p1928_p12 = pnand %p1927_p9, %p1921_p13 }
  0xb0   : > { %809 = vmatpush1.bf16.msra.mxu0 %v1704_v20  ;;  %1540 = vmatpush3.bf16.msra.mxu1 %v1779_v17  ;;  %v1782_v20 = vld [vmem:[#allocation7 + $0x60] sm:$0xff]  }
  0xb1   : > { %810 = vmatprep.subr.bf16.mxu0 %v1705_v21  ;;  %1541 = vmatprep.subr.bf16.mxu1 %v1780_v18  ;;  %v1783_v21 = vld [vmem:[#allocation7 + $0x20] sm:$0xff]  }
  0xb4   : > { %811 = vmatpush1.bf16.msra.mxu0 %v1707_v22  ;;  %1542 = vmatpush3.bf16.msra.mxu1 %v1781_v19  ;;  %v1784_v22 = vld [vmem:[#allocation7 + $0x68] sm:$0xff]  }
  0xb5   : > { %812 = vmatprep.subr.bf16.mxu0 %v1708_v23  ;;  %1543 = vmatprep.subr.bf16.mxu1 %v1782_v20  ;;  %v1785_v23 = vld [vmem:[#allocation7 + $0x28] sm:$0xff]   ;;  %v919_v20 = vld [vmem:[%s2340_s2] sm:$0x3] }
  0xb8   : > { %813 = vmatpush1.bf16.msra.mxu0 %v1710_v24  ;;  %1544 = vmatpush3.bf16.msra.mxu1 %v1783_v21  ;;  %v1786_v24 = vld [vmem:[#allocation7 + $0x70] sm:$0xff]  }
  0xb9   : > { %814 = vmatprep.subr.bf16.mxu0 %v1711_v25  ;;  %1545 = vmatprep.subr.bf16.mxu1 %v1784_v22  ;;  %v1787_v25 = vld [vmem:[#allocation7 + $0x30] sm:$0xff]   ;;  %v2271_v22 = vsub.s32 0, %v931_v14 }
  0xbc   : > { %815 = vmatpush1.bf16.msra.mxu0 %v1713_v26  ;;  %1546 = vmatpush3.bf16.msra.mxu1 %v1785_v23  ;;  %v1788_v26 = vld [vmem:[#allocation7 + $0x78] sm:$0xff]   ;;  %v950_v23 = vsub.s32 1, %v931_v14 }
  0xbd   : > { %816 = vmatprep.subr.bf16.mxu0 %v1714_v27  ;;  %1547 = vmatprep.subr.bf16.mxu1 %v1786_v24  ;;  %v1789_v27 = vld [vmem:[#allocation7 + $0x38] sm:$0xff]   ;;  %v958_v24 = vld [vmem:[%s2341_s3] sm:$0x3] }
  0xc0   : > { %817 = vmatpush1.bf16.msra.mxu0 %v1716_v28  ;;  %1548 = vmatpush3.bf16.msra.mxu1 %v1787_v25 }
  0xc1   : > { %818 = vmatprep.subr.bf16.mxu0 %v1717_v29  ;;  %1549 = vmatprep.subr.bf16.mxu1 %v1788_v26 }
  0xc4   : > { %819 = vmatpush1.bf16.msra.mxu0 %v1719_v30  ;;  %1550 = vmatpush3.bf16.msra.mxu1 %v1789_v27 }
  0xc5   : > { %820 = vmatprep.subr.bf16.mxu0 %v1720_v31 }
  0xc8   : > { %821 = vmatpush1.bf16.msra.mxu0 %v1722_v32 }
  0xc9   : > { %822 = vmatprep.subr.bf16.mxu0 %v1723_v33 }
  0xcc   : > { %823 = vmatpush1.bf16.msra.mxu0 %v1725_v34 }
  0xcd   : > { %835 = vmatprep.subr.bf16.mxu0 %v1728_v37 }
  0xcf   : > { %825 = vmatmul.mubr.bf16.vlgmr.msra.gmra.mrb[0].mxu0 %v404_v40 }
  0xd0   : > { %836 = vmatpush1.bf16.msra.mxu0 %v1726_v41  ;;  %867 = vmatprep.mubr.bf16.mxu0 %v407_v42 }
  0xd1   : > { %837 = vmatprep.subr.bf16.mxu0 %v1731_v43 }
  0xd4   : > { %838 = vmatpush1.bf16.msra.mxu0 %v1729_v44 }
  0xd5   : > { %839 = vmatprep.subr.bf16.mxu0 %v1734_v45 }
  0xd8   : > { %840 = vmatpush1.bf16.msra.mxu0 %v1732_v46 }
  0xd9   : > { %841 = vmatprep.subr.bf16.mxu0 %v1737_v47 }
  0xdc   : > { %842 = vmatpush1.bf16.msra.mxu0 %v1735_v48 }
  0xdd   : > { %843 = vmatprep.subr.bf16.mxu0 %v1740_v49 }
  0xe0   : > { %844 = vmatpush1.bf16.msra.mxu0 %v1738_v50 }
  0xe1   : > { %845 = vmatprep.subr.bf16.mxu0 %v1743_v51 }
  0xe4   : > { %846 = vmatpush1.bf16.msra.mxu0 %v1741_v52 }
  0xe5   : > { %847 = vmatprep.subr.bf16.mxu0 %v1746_v53 }
  0xe8   : > { %848 = vmatpush1.bf16.msra.mxu0 %v1744_v54 }
  0xe9   : > { %849 = vmatprep.subr.bf16.mxu0 %v1749_v55 }
  0xec   : > { %850 = vmatpush1.bf16.msra.mxu0 %v1747_v56 }
  0xed   : > { %851 = vmatprep.subr.bf16.mxu0 %v1752_v57 }
  0xf0   : > { %852 = vmatpush1.bf16.msra.mxu0 %v1750_v58 }
  0xf1   : > { %853 = vmatprep.subr.bf16.mxu0 %v1755_v59 }
  0xf4   : > { %854 = vmatpush1.bf16.msra.mxu0 %v1753_v60 }
  0xf5   : > { %855 = vmatprep.subr.bf16.mxu0 %v1758_v61 }
  0xf8   : > { %856 = vmatpush1.bf16.msra.mxu0 %v1756_v62 }
  0xf9   : > { %857 = vmatprep.subr.bf16.mxu0 %v1761_v63 }
  0xfc   : > { %858 = vmatpush1.bf16.msra.mxu0 %v1759_v0 }
  0xfd   : > { %859 = vmatprep.subr.bf16.mxu0 %v1764_v1 }
 0x100   : > { %860 = vmatpush1.bf16.msra.mxu0 %v1762_v2 }
 0x101   : > { %861 = vmatprep.subr.bf16.mxu0 %v1767_v3 }
 0x104   : > { %862 = vmatpush1.bf16.msra.mxu0 %v1765_v4 }
 0x105   : > { %863 = vmatprep.subr.bf16.mxu0 %v1770_v5 }
 0x108   : > { %864 = vmatpush1.bf16.msra.mxu0 %v1768_v6 }
 0x109   : > { %865 = vmatprep.subr.bf16.mxu0 %v1773_v7 }
 0x10c   : > { %866 = vmatpush1.bf16.msra.mxu0 %v1771_v8 }
 0x10f   : > { %868 = vmatmul.mubr.bf16.vlgmr.msra.gmra.mrb[0].mxu0 %v406_v11  ;;  %v928_v11 = vunpack.c.l.s4 %v2004_v10 }
 0x111   : > { %v929_v13 = vunpack.c.0.s8 %v928_v11 }
 0x113   : > { %v932_v16 = vsub.s32 %v929_v13, %v931_v14 }
 0x1e2   : > { %v869_v28 = vpop.f32.mrb[0].mxu0 }
 0x1e3   : > { %v871_v29 = vpop.f32.mrb[1].mxu0 }
 0x1e4   : > { %v873_v30 = vpop.f32.mrb[2].mxu0 }
 0x1e5   : > { %v878_v31 = vadd.f32 %v873_v30, %v869_v28  ;;  %v875_v32 = vpop.f32.mrb[3].mxu0 }
 0x1e6   : > { %v885_v33 = vadd.f32 %v875_v32, %v871_v29 }
 0x1e7   : > { %v879_v34 = vrot.slane %v878_v31, 4 }
 0x1e8   : > { %v886_v35 = vrot.slane %v885_v33, 4 }
 0x1e9   : > { %v880_v36 = vadd.f32 %v879_v34, %v878_v31 }
 0x1ea   : > { %v887_v37 = vadd.f32 %v886_v35, %v885_v33 }
 0x1eb   : > { %v881_v38 = vrot.slane %v880_v36, 2 }
 0x1ec   : > { %v888_v39 = vrot.slane %v887_v37, 2 }
 0x1ed   : > { %v882_v40 = vadd.f32 %v881_v38, %v880_v36 }
 0x1ee   : > { %v889_v41 = vadd.f32 %v888_v39, %v887_v37 }
 0x1ef   : > { %v883_v42 = vrot.slane %v882_v40, 1 }
 0x1f0   : > { %v890_v43 = vrot.slane %v889_v41, 1 }
 0x1f1   : > { %v884_v44 = vadd.f32 %v883_v42, %v882_v40 }
 0x1f2   : > { %v891_v45 = vadd.f32 %v890_v43, %v889_v41 }
 0x1f3   : > { %v893_v46 = vmul.f32 0.0625, %v884_v44  ;;  %v1790_v44 = vld [vmem:[#allocation8] sm:$0xff]  }
 0x1f4   : > { %v894_v47 = vmul.f32 0.0625, %v891_v45  ;;  %v2005_v45 = vmov 0.0  }
 0x1f5   : > { %v895_v48 = vsub.f32 %v869_v28, %v893_v46  ;;  %v897_v49 = vsub.f32 %v873_v30, %v893_v46  ;;  %v963_v28 = vrot.slane %v958_v24, %v2271_v22  ;;  %1566 = vmatprep.subr.bf16.mxu1 %v2005_v45  ;;  %v1791_v46 = vld [vmem:[#allocation8 + $0x8] sm:$0xff]  }
 0x1f6   : > { %v896_v50 = vsub.f32 %v871_v29, %v894_v47  ;;  %v898_v51 = vsub.f32 %v875_v32, %v894_v47  ;;  %v967_v29 = vrot.slane %v958_v24, %v950_v23  ;;  %v1792_v47 = vld [vmem:[#allocation8 + $0x10] sm:$0xff]  }
 0x1f7   : > { %v899_v52 = vmul.f32 %v895_v48, %v895_v48  ;;  %v901_v53 = vmul.f32 %v897_v49, %v897_v49 }
 0x1f8   : > { %v900_v54 = vmul.f32 %v896_v50, %v896_v50  ;;  %v902_v55 = vmul.f32 %v898_v51, %v898_v51 }
 0x1f9   : > { %v903_v56 = vadd.f32 %v901_v53, %v899_v52  ;;  %v1797_v52 = vld [vmem:[#allocation8 + $0x38] sm:$0xff]  }
 0x1fa   : > { %v910_v57 = vadd.f32 %v902_v55, %v900_v54 }
 0x1fb   : > { %v904_v58 = vrot.slane %v903_v56, 4 }
 0x1fc   : > { %v911_v59 = vrot.slane %v910_v57, 4 }
 0x1fd   : > { %v905_v60 = vadd.f32 %v904_v58, %v903_v56 }
 0x1fe   : > { %v912_v61 = vadd.f32 %v911_v59, %v910_v57 }
 0x1ff   : > { %v906_v62 = vrot.slane %v905_v60, 2 }
 0x200   : > { %v913_v63 = vrot.slane %v912_v61, 2 }
 0x201   : > { %v907_v0 = vadd.f32 %v906_v62, %v905_v60 }
 0x202   : > { %v914_v1 = vadd.f32 %v913_v63, %v912_v61 }
 0x203   : > { %v908_v2 = vrot.slane %v907_v0, 1 }
 0x204   : > { %v915_v3 = vrot.slane %v914_v1, 1 }
 0x205   : > { %v909_v4 = vadd.f32 %v908_v2, %v907_v0 }
 0x206   : > { %v916_v5 = vadd.f32 %v915_v3, %v914_v1 }
 0x207   : > { %v917_v6 = vmul.f32 0.0625, %v909_v4 }
 0x208   : > { %v918_v7 = vmul.f32 0.0625, %v916_v5 }
 0x209   : > { %v920_v8 = vadd.f32 1e-05, %v917_v6 }
 0x20a   : > { %v921_v9 = vadd.f32 1e-05, %v918_v7 }
 0x20b   : > { %1798 = vrsqrt.f32 %v920_v8 }
 0x20c   : > { %1800 = vrsqrt.f32 %v921_v9 }
 0x215   : > { %v1799_v15 = vpop.eup %1798 }
 0x216   : > { %v1801_v17 = vpop.eup %1800 }
 0x217   : > { %v926_v18 = vcombine.low %v1799_v15, %v1801_v17 }
 0x219   : > { %v933_v19 = vrot.slane %v926_v18, %v932_v16 }
 0x21b   : > { %v940_v21 = vrot.slane %v933_v19, %v932_v16  ;;  %v1169_v16 = vld [vmem:[%s2343_s5] sm:$0x1] }
 0x21d   : > { %v942_v25 = vmul.f32 %v940_v21, %v919_v20  ;;  %v1518_v20 = vld [vmem:[%s2344_s6] ss:$0 sm:$0xff] }
 0x21f   : > { %v947_v26 = vrot.slane %v942_v25, %v2271_v22  ;;  %v951_v27 = vrot.slane %v942_v25, %v950_v23 }
 0x221   : > { %v957_v30 = vmul.f32 %v951_v27, %v898_v51  ;;  %v955_v31 = vmul.f32 %v951_v27, %v896_v50  ;;  %v954_v32 = vmul.f32 %v947_v26, %v895_v48  ;;  %v956_v33 = vmul.f32 %v947_v26, %v897_v49  ;;  %v1793_v48 = vld [vmem:[#allocation8 + $0x18] sm:$0xff]   ;;  %v1794_v49 = vld [vmem:[#allocation8 + $0x20] sm:$0xff]   ;;  %v1795_v50 = vld [vmem:[#allocation8 + $0x28] sm:$0xff]  }
 0x222   : > { %v1796_v51 = vld [vmem:[#allocation8 + $0x30] sm:$0xff]  }
 0x223   : > { %v971_v34 = vadd.f32 %v967_v29, %v955_v31  ;;  %v973_v35 = vadd.f32 %v967_v29, %v957_v30  ;;  %v970_v36 = vadd.f32 %v963_v28, %v954_v32  ;;  %v972_v37 = vadd.f32 %v963_v28, %v956_v33  ;;  %v1519_v29 = vld [vmem:[%s2346_s8] ss:$0 sm:$0xff] }
 0x225   : > { %v975_v38 = vmax.f32 %v971_v34, 0.0  ;;  %v977_v39 = vmax.f32 %v973_v35, 0.0  ;;  %v974_v40 = vmax.f32 %v970_v36, 0.0  ;;  %v976_v41 = vmax.f32 %v972_v37, 0.0 }
 0x227   : > { %v979_v42 = vpack.c.bf16 %v977_v39, %v975_v38  ;;  %v978_v43 = vpack.c.bf16 %v976_v41, %v974_v40 }
 0x229   : > { %1140 = vmatprep.mubr.bf16.mxu1 %v979_v42 }
 0x22a   : > { %1141 = vmatmul.mubr.bf16.vlgmr.msra.gmra.mrb[0].mxu1 %v978_v43 }
 0x22b   : > { %1567 = vmatpush3.bf16.msra.mxu1 %v1790_v44  ;;  %1582 = vmatprep.mubr.msk.bf16.mxu1 %vm2006_vm0, %v2005_v45 }
 0x22c   : > { %1568 = vmatprep.subr.bf16.mxu1 %v2005_v45 }
 0x22f   : > { %1569 = vmatpush3.bf16.msra.mxu1 %v1791_v46 }
 0x230   : > { %1570 = vmatprep.subr.bf16.mxu1 %v2005_v45 }
 0x233   : > { %1571 = vmatpush3.bf16.msra.mxu1 %v1792_v47 }
 0x234   : > { %1572 = vmatprep.subr.bf16.mxu1 %v2005_v45 }
 0x237   : > { %1573 = vmatpush3.bf16.msra.mxu1 %v1793_v48 }
 0x238   : > { %1574 = vmatprep.subr.bf16.mxu1 %v2005_v45 }
 0x23b   : > { %1575 = vmatpush3.bf16.msra.mxu1 %v1794_v49 }
 0x23c   : > { %1576 = vmatprep.subr.bf16.mxu1 %v2005_v45 }
 0x23f   : > { %1577 = vmatpush3.bf16.msra.mxu1 %v1795_v50 }
 0x240   : > { %1578 = vmatprep.subr.bf16.mxu1 %v2005_v45 }
 0x243   : > { %1579 = vmatpush3.bf16.msra.mxu1 %v1796_v51 }
 0x244   : > { %1580 = vmatprep.subr.bf16.mxu1 %v2005_v45 }
 0x247   : > { %1581 = vmatpush3.bf16.msra.mxu1 %v1797_v52 }
 0x2fd   : > { %v1551_v53 = vpop.f32.mrb[0].mxu1 }
 0x2fe   : > { %v1552_v54 = vpop.f32.mrb[1].mxu1 }
 0x2ff   : > { %v1553_v55 = vadd.f32 %v1552_v54, %v1551_v53  ;;  %v1554_v56 = vpop.f32.mrb[2].mxu1 }
 0x300   : > { %v1555_v57 = vpop.f32.mrb[3].mxu1 }
 0x301   : > { %v1556_v58 = vadd.f32 %v1555_v57, %v1554_v56 }
 0x303   : > { %v1149_v59 = vadd.f32 %v1556_v58, %v1553_v55 }
 0x305   : > { %v1150_v60 = vrot.slane %v1149_v59, 4 }
 0x307   : > { %v1151_v61 = vadd.f32 %v1150_v60, %v1149_v59 }
 0x309   : > { %v1152_v62 = vrot.slane %v1151_v61, 2 }
 0x30b   : > { %v1153_v63 = vadd.f32 %v1152_v62, %v1151_v61 }
 0x30d   : > { %v1154_v0 = vrot.slane %v1153_v63, 1 }
 0x30f   : > { %v1155_v1 = vadd.f32 %v1154_v0, %v1153_v63 }
 0x311   : > { %v1156_v2 = vmul.f32 0.0625, %v1155_v1 }
 0x313   : > { %v1157_v3 = vsub.f32 %v1553_v55, %v1156_v2  ;;  %v1158_v4 = vsub.f32 %v1556_v58, %v1156_v2 }
 0x315   : > { %v1159_v5 = vmul.f32 %v1157_v3, %v1157_v3  ;;  %v1160_v6 = vmul.f32 %v1158_v4, %v1158_v4 }
 0x317   : > { %v1161_v7 = vadd.f32 %v1160_v6, %v1159_v5 }
 0x319   : > { %v1162_v8 = vrot.slane %v1161_v7, 4 }
 0x31b   : > { %v1163_v9 = vadd.f32 %v1162_v8, %v1161_v7 }
 0x31d   : > { %v1164_v10 = vrot.slane %v1163_v9, 2 }
 0x31f   : > { %v1165_v11 = vadd.f32 %v1164_v10, %v1163_v9 }
 0x321   : > { %v1166_v12 = vrot.slane %v1165_v11, 1 }
 0x323   : > { %v1167_v13 = vadd.f32 %v1166_v12, %v1165_v11 }
 0x325   : > { %v1168_v14 = vmul.f32 0.0625, %v1167_v13 }
 0x327   : > { %v1170_v15 = vadd.f32 1e-05, %v1168_v14 }
 0x329   : > { %1802 = vrsqrt.f32 %v1170_v15 }
 0x333   : > { %v1803_v17 = vpop.eup %1802 }
 0x334   : > { %v1172_v18 = vmul.f32 %v1803_v17, %v1169_v16 }
 0x336   : > { %v1177_v19 = vrot.slane %v1172_v18, %v2271_v22 }
 0x338   : > { %v1179_v21 = vmul.f32 %v1177_v19, %v1157_v3  ;;  %v1180_v23 = vmul.f32 %v1177_v19, %v1158_v4 }
 0x33a   : > { %v1188_v24 = vadd.f32 %v1518_v20, %v1179_v21  ;;  %v1189_v25 = vadd.f32 %v1518_v20, %v1180_v23 }
 0x33c   : > { %v1190_v26 = vmax.f32 %v1188_v24, 0.0  ;;  %v1191_v27 = vmax.f32 %v1189_v25, 0.0 }
 0x33e   : > { %v1192_v28 = vpack.c.bf16 %v1191_v27, %v1190_v26 }
 0x340   : > { %1583 = vmatmul.mubr.bf16.vlgmr.msra.gmra.mrb[4].mxu1 %v1192_v28 }
 0x413   : > { %v1298_v22 = vpop.f32.mrb[4].mxu1 }
 0x414   : > { %v1299_v30 = vadd.f32 %v1519_v29, %v1298_v22  ;;  %v1584_v31 = vpop.f32.mrb[5].mxu1 }
 0x415   : > { %v1301_v32 = vpop.f32.mrb[6].mxu1 }
 0x416   : > { %1305 = vst [vmem:[%s394_s23] sm:$0xff] %v1299_v30  ;;  %v1302_v33 = vadd.f32 %v1519_v29, %v1301_v32  ;;  %v1585_v34 = vpop.f32.mrb[7].mxu1 }
 0x418   : > { %1306 = vst [vmem:[%s394_s23 + $0x8] sm:$0xff] %v1302_v33 }
 0x419   : > { %1931 = shalt.err (!%p1928_p12)
}
 0x41a   : > { %s1932_s14 = scalar_lea.hbm %s2295_s16, 256  ;;  %s1936_s21 = scalar_lea.hbm %s2373_s17, 1024 }
 0x41b   : > { %p1933_p0 = scmp.ne.s32.totalorder %s2295_s16, %s1932_s14  ;;  %p1937_p11 = scmp.lt.u32.totalorder %s2295_s16, %s2373_s17 }
 0x41c   : > { %p1938_p1 = scmp.lt.u32.totalorder %s1936_s21, %s1932_s14  ;;  %p1940_p4 = scmp.lt.u32.totalorder %s1932_s14, %s2295_s16 }
 0x41d   : > { %p1934_p5 = pnand %p1933_p0, %p2194_p8 }
 0x41e   : > { %p1939_p2 = por %p1938_p1, %p1937_p11 }
 0x41f   : > { %p1935_p10 = pneg %p1934_p5 }
 0x420   : > { %p1941_p6 = por %p1940_p4, %p1939_p2 }
 0x422   : > { %p1942_p13 = pnand %p1941_p6, %p1935_p10 }
 0x424   : > { %1945 = shalt.err (!%p1942_p13)
}
 0x425   : > { %s2008_s29 = smov 128   ;;  %s2009_s15 = smov 8  }
 0x426   : > { %1604 = dma.vmem_to_hbm [thread:$0]  (%p2194_p8), %s2290_s9, 256, %s2295_s16, %s1308_s25, %s2008_s29, %s2008_s29, %s2009_s15  }
 0x427 PF: > { %s2374_s13 = sld [smem:[#allocation15_spill]]  ;;  %s2375_s19 = sld [smem:[#allocation16_spill]] }
 0x428   : > { %p1631_p3 = scmp.ge.s32.totalorder %s1992_s12, 2 }
 0x42d   : > { %s1336_s22 = sand.u32 1, %s2374_s13   ;;  %p2376_p7 = scmp.ne.s32.totalorder %s2375_s19, 0 }
 0x42e   : > { %s1337_s24 = scalar_lea.sflag [#allocation4], %s1336_s22 }
 0x42f   : > { %p1621_p9 = pnand %p1631_p3, %p2376_p7 }
 0x431   : > { %1975 = dma.done.wait (!%p1621_p9), %s1337_s24, 256  }
 0x432   : > { %1977 = vsyncadd (!%p1621_p9), %s1337_s24, 4294967040  ;;  %p24_p12 = scmp.ge.s32.totalorder %s2162_s26, 6   ;;  %s2377_s30 = smov %s1984_s10 }
 0x433   : > { %s2378_s10 = smov %s1988_s11  ;;  %s2379_s11 = smov %s2190_s20 }
 0x434   : > { %s2380_s12 = smov %s2162_s26  ;;  %26 = sbr.rel (!%p24_p12) target bundleno = 10 (0xa), region = 113 }
 0x43b   :  { %1342 = vsyncpa [#allocation3], 1 }
 0x43c   :  { %1344 = vsyncpa [#allocation3 + $0x1], 1 }
 0x43d   :  { %1345 = vsyncpa [#allocation6], 1 }
 0x43e   :  { %1346 = vsyncpa [#allocation9], 1 }
 0x43f   :  { %1347 = vsyncpa [#allocation4], 1 }
 0x440   :  { %1349 = vsyncpa [#allocation4 + $0x1], 1 }

</bundles_post_ra>
